<compile_context>
chip_gen: v6e
topology: v6e:2x2x1
jax: 0.10.0
libtpu: 0.0.40
codegen_flags: <defaults>
</compile_context>

<pallas_src>
import functools

import jax
import jax.numpy as jnp
from jax.experimental import pallas as pl
from jax.experimental.pallas import tpu as pltpu

# Lane width of the output slab. 128 is the minimum lane-dense width; keeping
# it at 128 also keeps the MXU "deinterleave" matmul small (2*2C*C flops per
# 128 outputs) so the kernel stays HBM-bound on every generation.
_LANE_COLS = 128


def _linear_kernel(bias_ref, x_ref, p_ref, o_ref):
    """bias_ref: SMEM f32[1]                      -- bias scalar
    x_ref:    VMEM (block_rows, 2*_LANE_COLS)  -- interleaved features, lane-dense
    p_ref:    VMEM (2*_LANE_COLS, _LANE_COLS)  -- deinterleave x weight matrix
    o_ref:    VMEM (block_rows, _LANE_COLS)
    """
    acc = jnp.dot(
        x_ref[...],
        p_ref[...],
        preferred_element_type=jnp.float32,
        precision=jax.lax.Precision.HIGHEST,   # keep float32 accuracy on the MXU
    )
    o_ref[...] = (acc + bias_ref[0]).astype(o_ref.dtype)


@functools.partial(jax.jit, static_argnames=("block_rows",))
def net_forward(x: jax.Array, weight: jax.Array, bias: jax.Array,
                *, block_rows: int = 4096) -> jax.Array:
    """Forward pass of `Net`: x @ weight.T + bias.

    x      : (N, 2)  float32
    weight : (1, 2)  float32  (PyTorch nn.Linear layout)
    bias   : (1,)    float32
    returns (N, 1) float32
    """
    n, k = x.shape
    assert k == 2 and weight.shape == (1, 2) and bias.shape == (1,)

    c = _LANE_COLS
    assert c % 128 == 0  # lane-dense output blocks

    # Pallas path needs a free reshape to (N/c, 2c) with the row count a
    # multiple of 8 (full sublanes) => N % (8*c) == 0.  Small or ragged
    # batches: let XLA fuse the FMA (optimal there, no padding/slice pass).
    if n < 8 * c or n % (8 * c) != 0:
        return x @ weight.T + bias

    rows = n // c                       # slab rows (multiple of 8)
    x_slab = x.reshape(rows, 2 * c)     # contiguous row-major reshape: free, no copy

    # Constant "deinterleave + weight" matrix:  P[2j, j] = w0, P[2j+1, j] = w1.
    # out[r, j] = x_slab[r, 2j]*w0 + x_slab[r, 2j+1]*w1 = w0*x[b,0] + w1*x[b,1]
    # for batch element b = r*c + j.  Tiny (128 KiB), built once in the wrapper.
    w0 = weight[0, 0]
    w1 = weight[0, 1]
    eye = jnp.eye(c, dtype=jnp.float32)
    p_mat = jnp.stack([w0 * eye, w1 * eye], axis=1).reshape(2 * c, c)

    b_smem = bias.astype(jnp.float32).reshape(1)

    # Block-row selection: multiple of 8, divides `rows` exactly (no ragged
    # tail, no trailing slice), and keeps >= 4 grid steps when the batch is
    # large enough so megacore (v7x) can shard the "parallel" grid evenly.
    br = min(block_rows, rows)
    if rows >= 32:
        br = min(br, rows // 4)
    br = max(8, (br // 8) * 8)
    while rows % br:
        br -= 8
    grid = (rows // br,)

    # Per-step footprint at the default br=4096:
    #   HBM bytes  : br*(2c + c)*4      = 6 MiB   (>= 4 MiB target for v7x)
    #   VMEM (x2 buf): 2*(4 MiB + 2 MiB) + 2*128 KiB ~= 12.5 MiB
    #     -> fits v5e's 16 MiB scoped default; we raise the limit for headroom.
    out_slab = pl.pallas_call(
        _linear_kernel,
        out_shape=jax.ShapeDtypeStruct((rows, c), jnp.float32),
        grid_spec=pltpu.PrefetchScalarGridSpec(
            num_scalar_prefetch=0,
            grid=grid,
            in_specs=[
                pl.BlockSpec(memory_space=pltpu.MemorySpace.SMEM),      # bias scalar
                pl.BlockSpec((br, 2 * c), lambda i: (i, 0)),            # x slab rows
                pl.BlockSpec((2 * c, c), lambda i: (0, 0)),             # P (resident)
            ],
            out_specs=pl.BlockSpec((br, c), lambda i: (i, 0)),
        ),
        compiler_params=pltpu.CompilerParams(
            dimension_semantics=("parallel",),
            vmem_limit_bytes=32 * 1024 * 1024,
        ),
    )(b_smem, x_slab, p_mat)

    # (rows, c) -> (N, 1): contiguous reshape, free (no extra HBM pass).
    return out_slab.reshape(n, 1)


if __name__ == "__main__":
    key = jax.random.PRNGKey(0)

    # Small-but-tiled example: batch=8192 -> slab (64, 256), auto block of
    # 16 rows -> a 4-step "parallel" grid, so the BlockSpec pipeline (and
    # megacore sharding on v7x) is actually exercised.
    batch, in_features, out_features = 8192, 2, 1
    x = jax.random.normal(key, (batch, in_features), dtype=jnp.float32)

    # Deterministic parameter init mirroring the module's __init__:
    #   nn.init.zeros_(fc.weight) -> weight (1, 2) of zeros
    #   nn.init.ones_(fc.bias)    -> bias   (1,)   of ones
    weight = jnp.zeros((out_features, in_features), dtype=jnp.float32)
    bias = jnp.ones((out_features,), dtype=jnp.float32)

    out = jax.block_until_ready(net_forward(x, weight, bias))
    ref = x @ weight.T + bias
    assert out.shape == (batch, out_features)
    assert jnp.allclose(out, ref, atol=1e-6), "module-init check failed"

    # Non-trivial weights to validate the interleaved-feature contraction
    # (zero weights would hide any indexing bug).  Tolerance is loose enough
    # to cover a worst-case bf16 MXU pass even though HIGHEST is requested.
    kw, kb = jax.random.split(jax.random.PRNGKey(1))
    w_rand = jax.random.normal(kw, (out_features, in_features), jnp.float32)
    b_rand = jax.random.normal(kb, (out_features,), jnp.float32)
    out_r = jax.block_until_ready(net_forward(x, w_rand, b_rand))
    ref_r = x @ w_rand.T + b_rand
    assert jnp.allclose(out_r, ref_r, atol=5e-2, rtol=1e-2), "random-weight check failed"

    # Tiny / ragged batch exercises the XLA fallback path.
    x_small = jax.random.normal(jax.random.PRNGKey(2), (8, 2), jnp.float32)
    out_s = jax.block_until_ready(net_forward(x_small, w_rand, b_rand))
    assert jnp.allclose(out_s, x_small @ w_rand.T + b_rand, atol=1e-5)

    print("KERNEL_OK")
</pallas_src>

<mosaic_0001>
module attributes {stable_mosaic.version = 11 : i64} {
  func.func @_linear_kernel(%arg0: i32, %arg1: memref<1xf32, #tpu.memory_space<smem>>, %arg2: memref<16x256xf32, #tpu.memory_space<vmem>>, %arg3: memref<256x128xf32, #tpu.memory_space<vmem>>, %arg4: memref<16x128xf32, #tpu.memory_space<vmem>>) attributes {dimension_semantics = [#tpu.dimension_semantics<parallel>], iteration_bounds = array<i64: 4>, scalar_prefetch = 0 : i64, scratch_operands = 0 : i64, tpu.core_type = #tpu.core_type<tc>, window_params = [{transform_indices = @transform_0, window_bounds = array<i64: 1>}, {transform_indices = @transform_1, window_bounds = array<i64: 16, 256>}, {pipeline_mode = #tpu.pipeline_mode<synchronous>, transform_indices = @transform_2, window_bounds = array<i64: 256, 128>}, {transform_indices = @transform_3, window_bounds = array<i64: 16, 128>}]} {
    %c0 = arith.constant 0 : index
    %c0_0 = arith.constant 0 : index
    %0 = vector.load %arg2[%c0, %c0_0] : memref<16x256xf32, #tpu.memory_space<vmem>>, vector<16x256xf32>
    %c0_1 = arith.constant 0 : index
    %c0_2 = arith.constant 0 : index
    %1 = vector.load %arg3[%c0_1, %c0_2] : memref<256x128xf32, #tpu.memory_space<vmem>>, vector<256x128xf32>
    %cst = arith.constant dense<0.000000e+00> : vector<16x128xf32>
    %2 = tpu.matmul %0, %1, %cst {dimension_numbers = #tpu.dot_dimension_numbers<[1], [0], [0], [1], [0, 0, 1, 1], [], []>, precision = #tpu.contract_precision<fp32>} : vector<16x256xf32>, vector<256x128xf32>, vector<16x128xf32> -> vector<16x128xf32>
    %c0_3 = arith.constant 0 : index
    %3 = memref.load %arg1[%c0_3] : memref<1xf32, #tpu.memory_space<smem>>
    %4 = vector.broadcast %3 : f32 to vector<16x128xf32>
    %5 = arith.addf %2, %4 : vector<16x128xf32>
    %c0_4 = arith.constant 0 : index
    %c0_5 = arith.constant 0 : index
    %6 = vector.load %arg4[%c0_4, %c0_5] : memref<16x128xf32, #tpu.memory_space<vmem>>, vector<16x128xf32>
    tpu.vector_store %arg4[%c0_4, %c0_5], %5 {strides = array<i32>} : memref<16x128xf32, #tpu.memory_space<vmem>>, vector<16x128xf32>,
    return
  }
  func.func @transform_0(%arg0: i32) -> i32 {
    %c0_i32 = arith.constant 0 : i32
    %c0_i32_0 = arith.constant 0 : i32
    return %c0_i32 : i32
  }
  func.func @transform_1(%arg0: i32) -> (i32, i32) {
    %c0_i32 = arith.constant 0 : i32
    %c0_i32_0 = arith.constant 0 : i32
    return %arg0, %c0_i32 : i32, i32
  }
  func.func @transform_2(%arg0: i32) -> (i32, i32) {
    %c0_i32 = arith.constant 0 : i32
    %c0_i32_0 = arith.constant 0 : i32
    %c0_i32_1 = arith.constant 0 : i32
    return %c0_i32, %c0_i32_0 : i32, i32
  }
  func.func @transform_3(%arg0: i32) -> (i32, i32) {
    %c0_i32 = arith.constant 0 : i32
    %c0_i32_0 = arith.constant 0 : i32
    return %arg0, %c0_i32 : i32, i32
  }
}

</mosaic_0001>

<bundles_post_ra>
// kernel: net_forward.1
= control target key start
LH: loop header
LB: loop body
LE: loop exit
PB: predicated region body
PF: predicated region fallthrough
CT: control target
= control target key end

     0   :  { %s2434_s0 = inlined_call_operand.<no memory space> [shape: f32[1], index: 0, kind: input, shape index: {}]   ;;  %s2435_s1 = inlined_call_operand.vmem [shape: f32[64,256], index: 1, kind: input, shape index: {}]   ;;  %s2436_s2 = inlined_call_operand.vmem [shape: f32[256,128], index: 2, kind: input, shape index: {}]   ;;  %s2437_s3 = inlined_call_operand.hbm [shape: f32[64,128], index: 3, kind: output, shape index: {}]  }
   0x1   :  { %8 = sst [smem:[#allocation2]] %s2434_s0 }
   0x2   :  { %9 = vsyncpa [#allocation4], 0 }
   0x3   :  { %11 = vsyncpa [#allocation4 + $0x1], 0  ;;  %s1582_s14 = smov 0   ;;  %s1584_s15 = smov 0  }
   0x4   :  { %s1586_s16 = smov 0   ;;  %s1588_s17 = smov 0  }
   0x5 LB: > { %s1603_s0 = sadd.s32 4294967295, %s1554_s17   ;;  %s1210_s18 = sadd.s32 4294967294, %s1554_s17   ;;  %s1554_s17 = sphi %s1588_s17, %s2617_s17   ;;  %s1550_s16 = sphi %s1586_s16, %s2616_s16   ;;  %s1546_s15 = sphi %s1584_s15, %s2615_s15   ;;  %s1542_s14 = sphi %s1582_s14, %s2614_s14  }
   0x6   : > { %s1607_s19 = sadd.s32 1, %s1554_s17   ;;  %s92_s20 = sadd.s32 1, %s1550_s16 }
   0x7   : > { %s89_s21 = ssub.s32 %s1554_s17, %s1607_s19  ;;  %p102_p0 = scmp.ne.s32.totalorder %s1550_s16, %s1546_s15 }
   0x8   : > { %p90_p1 = scmp.eq.s32.totalorder %s89_s21, 0  ;;  %p103_p2 = scmp.eq.s32.totalorder %s1603_s0, 3 }
   0x9   : > { %p108_p3 = scmp.ne.s32.totalorder %s1546_s15, %s1542_s14  ;;  %p109_p4 = scmp.eq.s32.totalorder %s1210_s18, 3 }
   0xa   : > { %s1618_s22 = scalar_select %p90_p1, %s1550_s16, %s92_s20  }
   0xb   : > { %p1620_p5 = por %p103_p2, %p102_p0  ;;  %p1624_p6 = por %p109_p4, %p108_p3 }
   0xc   : > { %p1213_p7 = scmp.ge.s32.totalorder %s1554_s17, 1  ;;  %p143_p8 = scmp.lt.s32.totalorder %s1554_s17, 5 }
   0xe   : > { %p144_p9 = pnand %p1213_p7, %p143_p8 }
  0x10   : > { %147 = sbr.rel (%p144_p9) target bundleno = 360 (0x168), region = 32 }
  0x15   : > { %v211_v0 = vld [vmem:[%s2436_s2 + $0xf8] sm:$0xff]  ;;  %v210_v2 = vld [vmem:[%s2436_s2 + $0xf0] sm:$0xff]  ;;  %v209_v7 = vld [vmem:[%s2436_s2 + $0xe8] sm:$0xff]  ;;  %s1215_s27 = sshll.u32 %s1603_s0, 1  ;;  %s212_s11 = sld [smem:[#allocation2]] }
  0x16   : > { %v195_v1 = vld [vmem:[%s2436_s2 + $0x78] sm:$0xff]  ;;  %v1639_v3 = vand.u32 4294901760, %v211_v0  ;;  %v1643_v5 = vand.u32 4294901760, %v210_v2  ;;  %v194_v6 = vld [vmem:[%s2436_s2 + $0x70] sm:$0xff]  ;;  %v193_v8 = vld [vmem:[%s2436_s2 + $0x68] sm:$0xff]  ;;  %v1656_v10 = vand.u32 4294901760, %v209_v7 }
  0x17   : > { %v1641_v4 = vand.u32 4294901760, %v195_v1  ;;  %v1654_v9 = vand.u32 4294901760, %v194_v6  ;;  %v1658_v11 = vand.u32 4294901760, %v193_v8  ;;  %v208_v12 = vld [vmem:[%s2436_s2 + $0xe0] sm:$0xff]  ;;  %v1669_v14 = vld [vmem:[%s2436_s2 + $0xd8] sm:$0xff]  ;;  %v1690_v20 = vld [vmem:[%s2436_s2 + $0xd0] sm:$0xff] }
  0x18   : > { %v192_v13 = vld [vmem:[%s2436_s2 + $0x60] sm:$0xff]  ;;  %1225 = vmatprep.subr.mxu0 %v1639_v3  ;;  %v1672_v15 = vand.u32 4294901760, %v208_v12  ;;  %v1677_v17 = vand.u32 4294901760, %v1669_v14  ;;  %v1680_v18 = vsub.f32 %v211_v0, %v1639_v3  ;;  %v1685_v19 = vld [vmem:[%s2436_s2 + $0x58] sm:$0xff]  ;;  %v1695_v21 = vld [vmem:[%s2436_s2 + $0x50] sm:$0xff]  ;;  %v1705_v24 = vand.u32 4294901760, %v1690_v20 }
  0x19   : > { %v1674_v16 = vand.u32 4294901760, %v192_v13  ;;  %1226 = vmatpush3.msra.mxu0 %v1641_v4  ;;  %v1699_v22 = vand.u32 4294901760, %v1685_v19  ;;  %v1702_v23 = vsub.f32 %v195_v1, %v1641_v4  ;;  %v1708_v25 = vsub.f32 %v210_v2, %v1643_v5  ;;  %v1713_v26 = vld [vmem:[%s2436_s2 + $0xc8] sm:$0xff]  ;;  %v1723_v28 = vld [vmem:[%s2436_s2 + $0xc0] sm:$0xff]  ;;  %v1775_v46 = vld [vmem:[%s2436_s2 + $0xb8] sm:$0xff]  ;;  %p1857_p10 = scmp.lt.s32.totalorder %s1215_s27, 7 }
  0x1a   : > { %2513 = vst [vmem:[#allocation6_spill] sm:$0xff] %v1705_v24  ;;  %v1718_v27 = vld [vmem:[%s2436_s2 + $0x48] sm:$0xff]  ;;  %1227 = vmatprep.subr.mxu0 %v1643_v5  ;;  %v2451_v29 = vand.u32 4294901760, %v1680_v18  ;;  %v1728_v30 = vand.u32 4294901760, %v1695_v21  ;;  %v1731_v31 = vsub.f32 %v194_v6, %v1654_v9  ;;  %v1734_v32 = vand.u32 4294901760, %v1713_v26  ;;  %v1748_v37 = vld [vmem:[%s2436_s2 + $0x40] sm:$0xff] }
  0x1b   : > { %1228 = vmatpush3.msra.mxu0 %v1654_v9  ;;  %v2450_v33 = vand.u32 4294901760, %v1702_v23  ;;  %v2448_v34 = vand.u32 4294901760, %v1708_v25  ;;  %v1740_v35 = vsub.f32 %v209_v7, %v1656_v10  ;;  %v1743_v36 = vand.u32 4294901760, %v1718_v27  ;;  %v1788_v51 = vld [vmem:[%s2436_s2 + $0x38] sm:$0xff]  ;;  %v1798_v56 = vld [vmem:[%s2436_s2 + $0xb0] sm:$0xff]  ;;  %v1830_v2 = vld [vmem:[%s2436_s2 + $0xa8] sm:$0xff] }
  0x1c   : > { %2514 = vst [vmem:[#allocation7_spill] sm:$0xff] %v1728_v30  ;;  %2515 = vst [vmem:[#allocation8_spill] sm:$0xff] %v1734_v32  ;;  %1229 = vmatprep.subr.mxu0 %v1656_v10  ;;  %v457_v38 = vsub.f32 %v1680_v18, %v2451_v29  ;;  %v2447_v39 = vand.u32 4294901760, %v1731_v31  ;;  %v1756_v40 = vsub.f32 %v193_v8, %v1658_v11  ;;  %v1759_v41 = vand.u32 4294901760, %v1723_v28  ;;  %v1813_v61 = vld [vmem:[%s2436_s2 + $0x30] sm:$0xff]  ;;  %s2619_s27 = smov (!%p1857_p10, %s1215_s27), 7 }
  0x1d   : > { %2516 = vst [vmem:[#allocation9_spill] sm:$0xff] %v1743_v36  ;;  %1230 = vmatpush3.msra.mxu0 %v1658_v11  ;;  %v345_v42 = vsub.f32 %v1702_v23, %v2450_v33  ;;  %v464_v43 = vsub.f32 %v1708_v25, %v2448_v34  ;;  %v2445_v44 = vand.u32 4294901760, %v1740_v35  ;;  %v1770_v45 = vsub.f32 %v208_v12, %v1672_v15  ;;  %v1978_v33 = vld [vmem:[%s2436_s2 + $0x88] sm:$0xff]  ;;  %s1223_s29 = sshll.u32 %s2619_s27, 4  ;;  %s165_s12 = sand.u32 1, %s1546_s15  }
  0x1e   : > { %2517 = vst [vmem:[#allocation10_spill] sm:$0xff] %v1759_v41  ;;  %1231 = vmatprep.subr.mxu0 %v1672_v15  ;;  %v458_v47 = vand.u32 4294901760, %v457_v38  ;;  %v352_v48 = vsub.f32 %v1731_v31, %v2447_v39  ;;  %v2443_v49 = vand.u32 4294901760, %v1756_v40  ;;  %v1783_v50 = vand.u32 4294901760, %v1748_v37  ;;  %s2026_s8 = scalar_lea.vmem %s2435_s1, %s1223_s29  ;;  %s1214_s13 = sshll.u32 %s165_s12, 4 }
  0x1f   : > { %1232 = vmatpush3.msra.mxu0 %v1674_v16  ;;  %v346_v52 = vand.u32 4294901760, %v345_v42  ;;  %v465_v53 = vand.u32 4294901760, %v464_v43  ;;  %v471_v54 = vsub.f32 %v1740_v35, %v2445_v44  ;;  %v2442_v55 = vand.u32 4294901760, %v1770_v45  ;;  %v1951_v44 = vld [vmem:[%s2436_s2 + $0x90] sm:$0xff]  ;;  %s167_s18 = scalar_lea.vmem [#allocation3], %s1214_s13  ;;  %s1224_s21 = sshll.u32 %s1603_s0, 8 }
  0x20   : > { %2518 = vst [vmem:[#allocation11_spill] sm:$0xff] %v1783_v50  ;;  %1233 = vmatprep.subr.mxu0 %v1677_v17  ;;  %1263 = vmatprep.subr.mxu1 %v458_v47  ;;  %v353_v57 = vand.u32 4294901760, %v352_v48  ;;  %v359_v58 = vsub.f32 %v1756_v40, %v2443_v49  ;;  %v1805_v59 = vsub.f32 %v192_v13, %v1674_v16  ;;  %v1808_v60 = vand.u32 4294901760, %v1775_v46  ;;  %v1844_v13 = vld [vmem:[%s2436_s2 + $0x28] sm:$0xff]  ;;  %v1935_v49 = vld [vmem:[%s2436_s2 + $0x18] sm:$0xff]  ;;  %s1148_s20 = sshll.u32 %s167_s18, 4  ;;  %s2392_s28 = scalar_lea.hbm %s2437_s3, %s1224_s21  ;;  %s2387_s20 = int_to_ptr.vmem [resolvable:$true] %s1148_s20 }
  0x21   : > { %1234 = vmatpush3.msra.mxu0 %v1699_v22  ;;  %1264 = vmatpush3.msra.mxu1 %v346_v52  ;;  %v472_v62 = vand.u32 4294901760, %v471_v54  ;;  %v478_v63 = vsub.f32 %v1770_v45, %v2442_v55  ;;  %v1822_v0 = vsub.f32 %v1669_v14, %v1677_v17  ;;  %v1825_v1 = vand.u32 4294901760, %v1788_v51  ;;  %v1876_v52 = vld [vmem:[%s2436_s2 + $0xa0] sm:$0xff]  ;;  %s2394_s29 = scalar_lea.sflag [#allocation4], %s165_s12  ;;  %s1494_s27 = scalar_lea.vmem %s2387_s20, 256 }
  0x22   : > { %2519 = vst [vmem:[#allocation12_spill] sm:$0xff] %v1808_v60  ;;  %1235 = vmatprep.subr.mxu0 %v1705_v24  ;;  %1265 = vmatprep.subr.mxu1 %v465_v53  ;;  %v360_v6 = vand.u32 4294901760, %v359_v58  ;;  %v2441_v7 = vand.u32 4294901760, %v1805_v59  ;;  %v1836_v8 = vsub.f32 %v1685_v19, %v1699_v22  ;;  %v1839_v12 = vand.u32 4294901760, %v1798_v56  ;;  %p1495_p11 = scmp.ne.s32.totalorder %s2387_s20, %s1494_s27  ;;  %s1556_s0 = smov [#allocation3]  }
  0x23   : > { %2520 = vst [vmem:[#allocation13_spill] sm:$0xff] %v1825_v1  ;;  %1236 = vmatpush3.msra.mxu0 %v1728_v30  ;;  %1266 = vmatpush3.msra.mxu1 %v353_v57  ;;  %v479_v14 = vand.u32 4294901760, %v478_v63  ;;  %v2438_v38 = vand.u32 4294901760, %v1822_v0  ;;  %v1850_v42 = vsub.f32 %v1690_v20, %v1705_v24  ;;  %v1853_v19 = vand.u32 4294901760, %v1813_v61  ;;  %s1498_s30 = sshll.u32 %s1556_s0, 4  ;;  %s1499_s30 = int_to_ptr.vmem [resolvable:$false] %s1498_s30 }
  0x24   : > { %2521 = vst [vmem:[#allocation14_spill] sm:$0xff] %v1839_v12  ;;  %1237 = vmatprep.subr.mxu0 %v1734_v32  ;;  %1267 = vmatprep.subr.mxu1 %v472_v62  ;;  %v366_v43 = vsub.f32 %v1805_v59, %v2441_v7  ;;  %v2439_v47 = vand.u32 4294901760, %v1836_v8  ;;  %v1868_v20 = vsub.f32 %v1695_v21, %v1728_v30  ;;  %v1871_v48 = vand.u32 4294901760, %v1830_v2  ;;  %p1496_p12 = pnand %p1495_p11, %p1620_p5  ;;  %s1500_s4 = scalar_lea.vmem %s1499_s30, 512 }
  0x25   : > { %2522 = vst [vmem:[#allocation15_spill] sm:$0xff] %v1853_v19  ;;  %1238 = vmatpush3.msra.mxu0 %v1743_v36  ;;  %1268 = vmatpush3.msra.mxu1 %v360_v6  ;;  %v485_v53 = vsub.f32 %v1822_v0, %v2438_v38  ;;  %v2440_v54 = vand.u32 4294901760, %v1850_v42  ;;  %v1885_v21 = vsub.f32 %v1713_v26, %v1734_v32  ;;  %v1888_v57 = vand.u32 4294901760, %v1844_v13  ;;  %v1902_v26 = vld [vmem:[%s2436_s2 + $0x20] sm:$0xff]  ;;  %p1501_p0 = scmp.lt.s32.totalorder %s2387_s20, %s1499_s30  ;;  %p1502_p1 = scmp.lt.s32.totalorder %s1500_s4, %s1494_s27 }
  0x26   : > { %2524 = vst [vmem:[#allocation16_spill] sm:$0xff] %v1871_v48  ;;  %1239 = vmatprep.subr.mxu0 %v1759_v41  ;;  %1269 = vmatprep.subr.mxu1 %v479_v14  ;;  %v367_v58 = vand.u32 4294901760, %v366_v43  ;;  %v373_v62 = vsub.f32 %v1836_v8, %v2439_v47  ;;  %v2444_v63 = vand.u32 4294901760, %v1868_v20  ;;  %v1897_v6 = vsub.f32 %v1718_v27, %v1743_v36  ;;  %v1915_v27 = vld [vmem:[%s2436_s2 + $0x98] sm:$0xff]  ;;  %p1497_p13 = pneg %p1496_p12 }
  0x27   : > { %2525 = vst [vmem:[#allocation17_spill] sm:$0xff] %v1888_v57  ;;  %1240 = vmatpush3.msra.mxu0 %v1783_v50  ;;  %v486_v38 = vand.u32 4294901760, %v485_v53  ;;  %v492_v14 = vsub.f32 %v1850_v42, %v2440_v54  ;;  %v2446_v43 = vand.u32 4294901760, %v1885_v21  ;;  %v1910_v47 = vand.u32 4294901760, %v1876_v52  ;;  %p1503_p2 = por %p1502_p1, %p1501_p0 }
  0x28   : > { %1270 = vmatpush3.msra.mxu1 %v367_v58  ;;  %1241 = vmatprep.subr.mxu0 %v1808_v60  ;;  %v374_v53 = vand.u32 4294901760, %v373_v62  ;;  %v380_v54 = vsub.f32 %v1868_v20, %v2444_v63  ;;  %v2449_v7 = vand.u32 4294901760, %v1897_v6  ;;  %v1930_v55 = vsub.f32 %v1723_v28, %v1759_v41 }
  0x29   : > { %2526 = vst [vmem:[#allocation18_spill] sm:$0xff] %v1910_v47  ;;  %1271 = vmatprep.subr.mxu1 %v486_v38  ;;  %1242 = vmatpush3.msra.mxu0 %v1825_v1  ;;  %v493_v58 = vand.u32 4294901760, %v492_v14  ;;  %v499_v62 = vsub.f32 %v1885_v21, %v2446_v43  ;;  %v1942_v63 = vand.u32 4294901760, %v1902_v26  ;;  %v1946_v28 = vsub.f32 %v1748_v37, %v1783_v50  ;;  %v1964_v37 = vld [vmem:[%s2436_s2 + $0x10] sm:$0xff]  ;;  %p1504_p3 = pnand %p1503_p2, %p1497_p13 }
  0x2a   : > { %1272 = vmatpush3.msra.mxu1 %v374_v53  ;;  %1243 = vmatprep.subr.mxu0 %v1839_v12  ;;  %v381_v38 = vand.u32 4294901760, %v380_v54  ;;  %v387_v14 = vsub.f32 %v1897_v6, %v2449_v7  ;;  %v2454_v43 = vand.u32 4294901760, %v1930_v55  ;;  %v1959_v39 = vand.u32 4294901760, %v1915_v27 }
  0x2b   : > { %2527 = vst [vmem:[#allocation19_spill] sm:$0xff] %v1942_v63  ;;  %1273 = vmatprep.subr.mxu1 %v493_v58  ;;  %1244 = vmatpush3.msra.mxu0 %v1853_v19  ;;  %v500_v53 = vand.u32 4294901760, %v499_v62  ;;  %v2455_v54 = vand.u32 4294901760, %v1946_v28  ;;  %v1970_v34 = vsub.f32 %v1775_v46, %v1808_v60  ;;  %v1973_v7 = vand.u32 4294901760, %v1935_v49 }
  0x2c   : > { %2528 = vst [vmem:[#allocation20_spill] sm:$0xff] %v1959_v39  ;;  %1274 = vmatpush3.msra.mxu1 %v381_v38  ;;  %1245 = vmatprep.subr.mxu0 %v1871_v48  ;;  %v388_v58 = vand.u32 4294901760, %v387_v14  ;;  %v506_v62 = vsub.f32 %v1930_v55, %v2454_v43  ;;  %v1987_v46 = vsub.f32 %v1788_v51, %v1825_v1  ;;  %v1990_v29 = vand.u32 4294901760, %v1951_v44  ;;  %v2007_v51 = vld [vmem:[%s2436_s2 + $0x8] sm:$0xff] }
  0x2d   : > { %2529 = vst [vmem:[#allocation21_spill] sm:$0xff] %v1973_v7  ;;  %1275 = vmatprep.subr.mxu1 %v500_v53  ;;  %1246 = vmatpush3.msra.mxu0 %v1888_v57  ;;  %v394_v38 = vsub.f32 %v1946_v28, %v2455_v54  ;;  %v1999_v60 = vsub.f32 %v1798_v56, %v1839_v12  ;;  %v2002_v43 = vand.u32 4294901760, %v1964_v37  ;;  %v2016_v56 = vand.u32 4294901760, %v1978_v33  ;;  %v2021_v12 = vld [vmem:[%s2436_s2 + $0x80] sm:$0xff] }
  0x2e   : > { %2530 = vst [vmem:[#allocation22_spill] sm:$0xff] %v1990_v29  ;;  %1276 = vmatpush3.msra.mxu1 %v388_v58  ;;  %1247 = vmatprep.subr.mxu0 %v1910_v47  ;;  %v507_v53 = vand.u32 4294901760, %v506_v62  ;;  %v2013_v14 = vsub.f32 %v1813_v61, %v1853_v19  ;;  %v2533_v62 = vand.u32 4294901760, %v1970_v34  ;;  %v2035_v19 = vsub.f32 %v1830_v2, %v1871_v48  ;;  %v2052_v2 = vld [vmem:[%s2436_s2] sm:$0xff] }
  0x2f   : > { %2531 = vst [vmem:[#allocation23_spill] sm:$0xff] %v2002_v43  ;;  %2532 = vst [vmem:[#allocation24_spill] sm:$0xff] %v2016_v56  ;;  %1248 = vmatpush3.msra.mxu0 %v1942_v63  ;;  %v395_v58 = vand.u32 4294901760, %v394_v38  ;;  %v2474_v54 = vand.u32 4294901760, %v1999_v60  ;;  %v2535_v1 = vand.u32 4294901760, %v1987_v46  ;;  %v2043_v41 = vand.u32 4294901760, %v2007_v51 }
  0x30   : > { %v513_v61 = vsub.f32 %v1970_v34, %v2533_v62  ;;  %2534 = vst [vmem:[#allocation25_spill] sm:$0xff] %v2035_v19  ;;  %1277 = vmatprep.subr.mxu1 %v507_v53  ;;  %1249 = vmatprep.subr.mxu0 %v1959_v39  ;;  %v2047_v62 = vsub.f32 %v1844_v13, %v1888_v57  ;;  %v2060_v48 = vand.u32 4294901760, %v2021_v12  ;;  %v177_v13 = vld [vmem:[%s2026_s8 + $0x8] sm:$0xff]  ;;  %v2537_v36 = vand.u32 4294901760, %v2013_v14 }
  0x31   : > { %v401_v50 = vsub.f32 %v1987_v46, %v2535_v1  ;;  %1278 = vmatpush3.msra.mxu1 %v395_v58  ;;  %1250 = vmatpush3.msra.mxu0 %v1973_v7  ;;  %v520_v1 = vsub.f32 %v1999_v60, %v2474_v54  ;;  %v2070_v32 = vsub.f32 %v1876_v52, %v1910_v47  ;;  %v176_v54 = vld [vmem:[%s2026_s8] sm:$0xff]  ;;  %v2538_v30 = vand.u32 4294901760, %v2035_v19 }
  0x32   : > { %2536 = vst [vmem:[#allocation26_spill] sm:$0xff] %v2047_v62  ;;  %v514_v53 = vand.u32 4294901760, %v513_v61  ;;  %1251 = vmatprep.subr.mxu0 %v1990_v29  ;;  %v408_v58 = vsub.f32 %v2013_v14, %v2537_v36  ;;  %v2078_v24 = vand.u32 4294901760, %v2052_v2  ;;  %v2082_v36 = vsub.f32 %v1902_v26, %v1942_v63 }
  0x33   : > { %v402_v57 = vand.u32 4294901760, %v401_v50  ;;  %v521_v38 = vand.u32 4294901760, %v520_v1  ;;  %1252 = vmatpush3.msra.mxu0 %v2002_v43  ;;  %v527_v50 = vsub.f32 %v2035_v19, %v2538_v30  ;;  %v2540_v52 = vand.u32 4294901760, %v2047_v62 }
  0x34   : > { %1279 = vmatprep.subr.mxu1 %v514_v53  ;;  %2539 = vst [vmem:[#allocation27_spill] sm:$0xff] %v2082_v36  ;;  %v409_v61 = vand.u32 4294901760, %v408_v58  ;;  %1253 = vmatprep.subr.mxu0 %v2016_v56  ;;  %v2483_v1 = vand.u32 4294901760, %v2070_v32  ;;  %v2089_v47 = vand.u32 4294901760, %v177_v13  ;;  %v2484_v19 = vand.u32 4294901760, %v2082_v36 }
  0x35   : > { %1280 = vmatpush3.msra.mxu1 %v402_v57  ;;  %v415_v53 = vsub.f32 %v2047_v62, %v2540_v52  ;;  %v528_v30 = vand.u32 4294901760, %v527_v50  ;;  %1254 = vmatpush3.msra.mxu0 %v2043_v41  ;;  %v2095_v57 = vsub.f32 %v1915_v27, %v1959_v39  ;;  %v2097_v26 = vand.u32 4294901760, %v176_v54 }
  0x36   : > { %2541 = vst [vmem:[#allocation28_spill] sm:$0xff] %v2089_v47  ;;  %1281 = vmatprep.subr.mxu1 %v521_v38  ;;  %1255 = vmatprep.subr.mxu0 %v2060_v48  ;;  %v534_v52 = vsub.f32 %v2070_v32, %v2483_v1  ;;  %v2104_v38 = vsub.f32 %v177_v13, %v2089_v47 }
  0x37   : > { %2542 = vst [vmem:[#allocation29_spill] sm:$0xff] %v2097_v26  ;;  %1282 = vmatpush3.msra.mxu1 %v409_v61  ;;  %v416_v58 = vand.u32 4294901760, %v415_v53  ;;  %v2108_v50 = vsub.f32 %v1935_v49, %v1973_v7  ;;  %1256 = vmatpush3.msra.mxu0 %v2078_v24  ;;  %v422_v27 = vsub.f32 %v2082_v36, %v2484_v19 }
  0x38   : > { %1283 = vmatprep.subr.mxu1 %v528_v30  ;;  %v2116_v53 = vsub.f32 %v176_v54, %v2097_v26  ;;  %v2120_v13 = vsub.f32 %v1951_v44, %v1990_v29  ;;  %v535_v1 = vand.u32 4294901760, %v534_v52  ;;  %v2489_v49 = vand.u32 4294901760, %v2104_v38  ;;  %1301 = vmatprep.subr.mxu0 %v1680_v18 }
  0x39   : > { %2543 = vst [vmem:[#allocation30_spill] sm:$0xff] %v2108_v50  ;;  %1284 = vmatpush3.msra.mxu1 %v416_v58  ;;  %v2492_v30 = vand.u32 4294901760, %v2108_v50  ;;  %v2127_v19 = vsub.f32 %v1964_v37, %v2002_v43  ;;  %v423_v61 = vand.u32 4294901760, %v422_v27  ;;  %v2544_v54 = vand.u32 4294901760, %v2095_v57  ;;  %566 = vmatprep.mubr.f32.mxu1 %v2089_v47 }
  0x3a   : > { %1285 = vmatprep.subr.mxu1 %v535_v1  ;;  %v313_v52 = vsub.f32 %v2104_v38, %v2489_v49  ;;  %v2545_v58 = vand.u32 4294901760, %v2116_v53  ;;  %v2546_v47 = vand.u32 4294901760, %v2120_v13  ;;  %v2154_v43 = vsub.f32 %v2007_v51, %v2043_v41 }
  0x3b   : > { %v541_v7 = vsub.f32 %v2095_v57, %v2544_v54  ;;  %v429_v37 = vsub.f32 %v2108_v50, %v2492_v30  ;;  %v2144_v54 = vsub.f32 %v1978_v33, %v2016_v56  ;;  %1286 = vmatpush3.msra.mxu1 %v423_v61  ;;  %v2547_v29 = vand.u32 4294901760, %v2127_v19 }
  0x3c   : > { %v319_v1 = vsub.f32 %v2116_v53, %v2545_v58  ;;  %v548_v49 = vsub.f32 %v2120_v13, %v2546_v47  ;;  %v314_v30 = vand.u32 4294901760, %v313_v52  ;;  %v2499_v58 = vand.u32 4294901760, %v2154_v43 }
  0x3d   : > { %v542_v44 = vand.u32 4294901760, %v541_v7  ;;  %v430_v27 = vand.u32 4294901760, %v429_v37  ;;  %v436_v33 = vsub.f32 %v2127_v19, %v2547_v29  ;;  %v2500_v7 = vand.u32 4294901760, %v2144_v54 }
  0x3e   : > { %v320_v61 = vand.u32 4294901760, %v319_v1  ;;  %v549_v56 = vand.u32 4294901760, %v548_v49  ;;  %v2163_v47 = vsub.f32 %v2021_v12, %v2060_v48  ;;  %315 = vmatprep.mubr.f32.mxu0 %v314_v30  ;;  %v2170_v29 = vsub.f32 %v2052_v2, %v2078_v24  ;;  %v179_v1 = vld [vmem:[%s2026_s8 + $0x18] sm:$0xff] }
  0x3f   : > { %1287 = vmatprep.subr.mxu1 %v542_v44  ;;  %v437_v51 = vand.u32 4294901760, %v436_v33  ;;  %v555_v52 = vsub.f32 %v2144_v54, %v2500_v7  ;;  %v443_v49 = vsub.f32 %v2154_v43, %v2499_v58  ;;  %v2554_v58 = vld [vmem:[#allocation10_spill] sm:$0xff] }
  0x40   : > { %1288 = vmatpush3.msra.mxu1 %v430_v27  ;;  %2548 = vst [vmem:[#allocation31_spill] sm:$0xff] %v2170_v29  ;;  %321 = vmatmul.mubr.f32.vlgmr.msra.gmra.mxu0 %v320_v61  ;;  %v2498_v12 = vand.u32 4294901760, %v2163_v47  ;;  %v2497_v44 = vand.u32 4294901760, %v2170_v29  ;;  %v178_v61 = vld [vmem:[%s2026_s8 + $0x10] sm:$0xff] }
  0x41   : > { %1289 = vmatprep.subr.mxu1 %v549_v56  ;;  %1302 = vmatpush3.msra.mxu0 %v1702_v23  ;;  %v556_v30 = vand.u32 4294901760, %v555_v52  ;;  %v444_v2 = vand.u32 4294901760, %v443_v49  ;;  %v2198_v52 = vand.u32 4294901760, %v178_v61 }
  0x42   : > { %1290 = vmatpush3.msra.mxu1 %v437_v51  ;;  %1303 = vmatprep.subr.mxu0 %v1708_v25  ;;  %v562_v56 = vsub.f32 %v2163_v47, %v2498_v12  ;;  %v450_v37 = vsub.f32 %v2170_v29, %v2497_v44  ;;  %v2192_v51 = vand.u32 4294901760, %v179_v1  ;;  %v2553_v12 = vld [vmem:[#allocation9_spill] sm:$0xff] }
  0x43   : > { %1304 = vmatpush3.msra.mxu0 %v1731_v31  ;;  %1291 = vmatprep.subr.mxu1 %v556_v30  ;;  %v2212_v30 = vsub.f32 %v178_v61, %v2198_v52  ;;  %v2552_v61 = vld [vmem:[#allocation8_spill] sm:$0xff] }
  0x44   : > { %1305 = vmatprep.subr.mxu0 %v1740_v35  ;;  %1292 = vmatpush3.msra.mxu1 %v444_v2  ;;  %v563_v27 = vand.u32 4294901760, %v562_v56  ;;  %v451_v33 = vand.u32 4294901760, %v450_v37  ;;  %v2205_v49 = vsub.f32 %v179_v1, %v2192_v51  ;;  %v2549_v37 = vld [vmem:[#allocation6_spill] sm:$0xff]  ;;  %v2550_v1 = vld [vmem:[#allocation7_spill] sm:$0xff] }
  0x45   : > { %1306 = vmatpush3.msra.mxu0 %v1756_v40  ;;  %v2505_v56 = vand.u32 4294901760, %v2212_v30 }
  0x46   : > { %1293 = vmatprep.subr.mxu1 %v563_v27  ;;  %1307 = vmatprep.subr.mxu0 %v1770_v45  ;;  %v2501_v2 = vand.u32 4294901760, %v2205_v49 }
  0x47   : > { %1294 = vmatpush3.msra.mxu1 %v451_v33  ;;  %1308 = vmatpush3.msra.mxu0 %v1805_v59  ;;  %v2551_v33 = vld [vmem:[#allocation25_spill] sm:$0xff]  ;;  %v334_v44 = vsub.f32 %v2212_v30, %v2505_v56  ;;  %v2558_v56 = vld [vmem:[#allocation14_spill] sm:$0xff] }
  0x48   : > { %568 = vmatmul.mubr.f32.vlgmr.msra.gmra.mxu1 %v2097_v26  ;;  %1309 = vmatprep.subr.mxu0 %v1822_v0  ;;  %v328_v27 = vsub.f32 %v2205_v49, %v2501_v2  ;;  %v2555_v2 = vld [vmem:[#allocation11_spill] sm:$0xff]  ;;  %v2556_v26 = vld [vmem:[#allocation12_spill] sm:$0xff] }
  0x49   : > { %1339 = vmatprep.subr.mxu1 %v1639_v3  ;;  %1310 = vmatpush3.msra.mxu0 %v1836_v8 }
  0x4a   : > { %1340 = vmatpush3.msra.mxu1 %v1641_v4  ;;  %1311 = vmatprep.subr.mxu0 %v1850_v42  ;;  %v329_v7 = vand.u32 4294901760, %v328_v27  ;;  %v2560_v27 = vld [vmem:[#allocation16_spill] sm:$0xff] }
  0x4b   : > { %1341 = vmatprep.subr.mxu1 %v1643_v5  ;;  %1312 = vmatpush3.msra.mxu0 %v1868_v20 }
  0x4c   : > { %1342 = vmatpush3.msra.mxu1 %v1654_v9  ;;  %1313 = vmatprep.subr.mxu0 %v1885_v21 }
  0x4d   : > { %1343 = vmatprep.subr.mxu1 %v1656_v10  ;;  %1314 = vmatpush3.msra.mxu0 %v1897_v6 }
  0x4e   : > { %1344 = vmatpush3.msra.mxu1 %v1658_v11  ;;  %1315 = vmatprep.subr.mxu0 %v1930_v55 }
  0x4f   : > { %1345 = vmatprep.subr.mxu1 %v1672_v15  ;;  %1316 = vmatpush3.msra.mxu0 %v1946_v28 }
  0x50   : > { %1346 = vmatpush3.msra.mxu1 %v1674_v16  ;;  %1317 = vmatprep.subr.mxu0 %v1970_v34 }
  0x51   : > { %1347 = vmatprep.subr.mxu1 %v1677_v17  ;;  %1318 = vmatpush3.msra.mxu0 %v1987_v46 }
  0x52   : > { %1348 = vmatpush3.msra.mxu1 %v1699_v22  ;;  %1319 = vmatprep.subr.mxu0 %v1999_v60 }
  0x53   : > { %1349 = vmatprep.subr.mxu1 %v2549_v37  ;;  %1320 = vmatpush3.msra.mxu0 %v2013_v14 }
  0x54   : > { %1350 = vmatpush3.msra.mxu1 %v2550_v1  ;;  %1321 = vmatprep.subr.mxu0 %v2551_v33 }
  0x55   : > { %1351 = vmatprep.subr.mxu1 %v2552_v61  ;;  %1322 = vmatpush3.msra.mxu0 %v2047_v62  ;;  %v335_v62 = vand.u32 4294901760, %v334_v44  ;;  %v2557_v61 = vld [vmem:[#allocation13_spill] sm:$0xff]  ;;  %v2562_v44 = vld [vmem:[#allocation18_spill] sm:$0xff] }
  0x56   : > { %1352 = vmatpush3.msra.mxu1 %v2553_v12  ;;  %1323 = vmatprep.subr.mxu0 %v2070_v32 }
  0x57   : > { %1353 = vmatprep.subr.mxu1 %v2554_v58  ;;  %1324 = vmatpush3.msra.mxu0 %v2082_v36  ;;  %v2559_v36 = vld [vmem:[#allocation15_spill] sm:$0xff] }
  0x58   : > { %1354 = vmatpush3.msra.mxu1 %v2555_v2  ;;  %1325 = vmatprep.subr.mxu0 %v2095_v57 }
  0x59   : > { %1355 = vmatprep.subr.mxu1 %v2556_v26  ;;  %1326 = vmatpush3.msra.mxu0 %v2108_v50  ;;  %v2561_v50 = vld [vmem:[#allocation17_spill] sm:$0xff] }
  0x5a   : > { %1356 = vmatpush3.msra.mxu1 %v2557_v61  ;;  %1327 = vmatprep.subr.mxu0 %v2120_v13 }
  0x5b   : > { %1357 = vmatprep.subr.mxu1 %v2558_v56  ;;  %330 = vmatprep.mubr.f32.mxu0 %v329_v7  ;;  %v2564_v7 = vld [vmem:[#allocation21_spill] sm:$0xff] }
  0x5c   : > { %1328 = vmatpush3.msra.mxu0 %v2127_v19  ;;  %1358 = vmatpush3.msra.mxu1 %v2559_v36 }
  0x5d   : > { %336 = vmatmul.mubr.f32.gmra.mxu0 %v335_v62  ;;  %1329 = vmatprep.subr.mxu0 %v2144_v54  ;;  %v2563_v62 = vand.u32 4294901760, %v1680_v18  ;;  %v2570_v18 = vld [vmem:[#allocation24_spill] sm:$0xff] }
  0x5e   : > { %1359 = vmatprep.subr.mxu1 %v2560_v27  ;;  %1330 = vmatpush3.msra.mxu0 %v2154_v43 }
  0x5f   : > { %1360 = vmatpush3.msra.mxu1 %v2561_v50  ;;  %1331 = vmatprep.subr.mxu0 %v2163_v47  ;;  %v2565_v50 = vand.u32 4294901760, %v1702_v23  ;;  %v2571_v23 = vand.u32 4294901760, %v1740_v35  ;;  %v2575_v35 = vand.u32 4294901760, %v1805_v59  ;;  %v2580_v59 = vand.u32 4294901760, %v2205_v49 }
  0x60   : > { %1361 = vmatprep.subr.mxu1 %v2562_v44  ;;  %1332 = vmatpush3.msra.mxu0 %v2170_v29  ;;  %v2566_v44 = vld [vmem:[#allocation22_spill] sm:$0xff]  ;;  %v2567_v29 = vand.u32 4294901760, %v1708_v25  ;;  %v2572_v25 = vand.u32 4294901760, %v1756_v40  ;;  %v2578_v40 = vand.u32 4294901760, %v1836_v8  ;;  %v2587_v8 = vand.u32 4294901760, %v1970_v34  ;;  %v2592_v34 = vld [vmem:[#allocation8_spill] sm:$0xff] }
  0x61   : > { %710 = vmatprep.mubr.f32.mxu0 %v2104_v38  ;;  %1362 = vmatpush3.msra.mxu1 %v1942_v63  ;;  %v2568_v63 = vand.u32 4294901760, %v1731_v31  ;;  %v2573_v31 = vand.u32 4294901760, %v1770_v45  ;;  %v2579_v45 = vand.u32 4294901760, %v1850_v42 }
  0x62   : > { %713 = vmatmul.mubr.f32.vlgmr.msra.gmra.mxu0 %v2116_v53  ;;  %1363 = vmatprep.subr.mxu1 %v1959_v39  ;;  %v2569_v39 = vld [vmem:[#allocation23_spill] sm:$0xff] }
  0x63   : > { %1377 = vmatprep.subr.mxu0 %v2563_v62  ;;  %1364 = vmatpush3.msra.mxu1 %v2564_v7 }
  0x64   : > { %1378 = vmatpush3.msra.mxu0 %v2565_v50  ;;  %573 = vmatprep.mubr.f32.mxu1 %v2192_v51  ;;  %v2576_v50 = vand.u32 4294901760, %v2116_v53  ;;  %v2607_v53 = vld [vmem:[#allocation18_spill] sm:$0xff] }
  0x65   : > { %1365 = vmatprep.subr.mxu1 %v2566_v44  ;;  %1379 = vmatprep.subr.mxu0 %v2567_v29  ;;  %v2577_v29 = vand.u32 4294901760, %v1822_v0  ;;  %v2583_v0 = vand.u32 4294901760, %v1885_v21  ;;  %v2599_v21 = vld [vmem:[#allocation30_spill] sm:$0xff] }
  0x66   : > { %575 = vmatmul.mubr.f32.gmra.mxu1 %v2198_v52  ;;  %1380 = vmatpush3.msra.mxu0 %v2568_v63  ;;  %v2574_v63 = vand.u32 4294901760, %v2104_v38  ;;  %v2581_v38 = vand.u32 4294901760, %v1868_v20  ;;  %v2598_v20 = vand.u32 4294901760, %v2095_v57  ;;  %v2605_v57 = vld [vmem:[#allocation17_spill] sm:$0xff] }
  0x67   : > { %1366 = vmatpush3.msra.mxu1 %v2569_v39  ;;  %719 = vmatprep.mubr.f32.mxu0 %v2205_v49 }
  0x68   : > { %1367 = vmatprep.subr.mxu1 %v2570_v18  ;;  %1381 = vmatprep.subr.mxu0 %v2571_v23 }
  0x69   : > { %722 = vmatmul.mubr.f32.gmra.mxu0 %v2212_v30  ;;  %1368 = vmatpush3.msra.mxu1 %v2043_v41 }
  0x6a   : > { %1382 = vmatpush3.msra.mxu0 %v2572_v25  ;;  %1369 = vmatprep.subr.mxu1 %v2060_v48 }
  0x6b   : > { %1383 = vmatprep.subr.mxu0 %v2573_v31  ;;  %1370 = vmatpush3.msra.mxu1 %v2078_v24 }
  0x6c   : > { %826 = vmatprep.mubr.f32.mxu1 %v2574_v63  ;;  %1384 = vmatpush3.msra.mxu0 %v2575_v35 }
  0x6d   : > { %830 = vmatmul.mubr.f32.vlgmr.msra.gmra.mxu1 %v2576_v50  ;;  %1385 = vmatprep.subr.mxu0 %v2577_v29 }
  0x6e   : > { %1415 = vmatprep.subr.mxu1 %v1639_v3  ;;  %1386 = vmatpush3.msra.mxu0 %v2578_v40  ;;  %v2582_v3 = vand.u32 4294901760, %v2212_v30 }
  0x6f   : > { %1416 = vmatpush3.msra.mxu1 %v1641_v4  ;;  %1387 = vmatprep.subr.mxu0 %v2579_v45  ;;  %v2584_v4 = vand.u32 4294901760, %v1897_v6  ;;  %v2600_v6 = vand.u32 4294901760, %v2599_v21 }
  0x70   : > { %1417 = vmatprep.subr.mxu1 %v1643_v5  ;;  %837 = vmatprep.mubr.f32.mxu1 %v2580_v59  ;;  %v2585_v5 = vand.u32 4294901760, %v1930_v55 }
  0x71   : > { %1388 = vmatpush3.msra.mxu0 %v2581_v38  ;;  %1418 = vmatpush3.msra.mxu1 %v1654_v9  ;;  %v2586_v9 = vand.u32 4294901760, %v1946_v28  ;;  %v2602_v28 = vand.u32 4294901760, %v2127_v19 }
  0x72   : > { %841 = vmatmul.mubr.f32.gmra.mxu1 %v2582_v3  ;;  %1389 = vmatprep.subr.mxu0 %v2583_v0 }
  0x73   : > { %1419 = vmatprep.subr.mxu1 %v1656_v10  ;;  %1390 = vmatpush3.msra.mxu0 %v2584_v4  ;;  %v2588_v10 = vand.u32 4294901760, %v1987_v46  ;;  %v2603_v46 = vand.u32 4294901760, %v2144_v54  ;;  %v2612_v54 = vld [vmem:[#allocation29_spill] sm:$0xff] }
  0x74   : > { %1420 = vmatpush3.msra.mxu1 %v1658_v11  ;;  %1391 = vmatprep.subr.mxu0 %v2585_v5  ;;  %v2589_v11 = vand.u32 4294901760, %v1999_v60  ;;  %v2596_v60 = vld [vmem:[#allocation27_spill] sm:$0xff] }
  0x75   : > { %1421 = vmatprep.subr.mxu1 %v1672_v15  ;;  %1392 = vmatpush3.msra.mxu0 %v2586_v9  ;;  %v2590_v15 = vand.u32 4294901760, %v2013_v14  ;;  %v2597_v42 = vand.u32 4294901760, %v2596_v60  ;;  %v2604_v14 = vand.u32 4294901760, %v2154_v43 }
  0x76   : > { %1422 = vmatpush3.msra.mxu1 %v1674_v16  ;;  %1393 = vmatprep.subr.mxu0 %v2587_v8  ;;  %v2591_v16 = vand.u32 4294901760, %v2551_v33 }
  0x77   : > { %1423 = vmatprep.subr.mxu1 %v1677_v17  ;;  %1394 = vmatpush3.msra.mxu0 %v2588_v10  ;;  %v2593_v17 = vld [vmem:[#allocation26_spill] sm:$0xff] }
  0x78   : > { %1424 = vmatpush3.msra.mxu1 %v1699_v22  ;;  %1395 = vmatprep.subr.mxu0 %v2589_v11  ;;  %v2594_v55 = vand.u32 4294901760, %v2593_v17  ;;  %v2595_v22 = vand.u32 4294901760, %v2070_v32  ;;  %v2601_v32 = vand.u32 4294901760, %v2120_v13  ;;  %v2608_v13 = vld [vmem:[#allocation31_spill] sm:$0xff] }
  0x79   : > { %1425 = vmatprep.subr.mxu1 %v2549_v37  ;;  %1396 = vmatpush3.msra.mxu0 %v2590_v15  ;;  %v2609_v19 = vand.u32 4294901760, %v2608_v13 }
  0x7a   : > { %1426 = vmatpush3.msra.mxu1 %v2550_v1  ;;  %1397 = vmatprep.subr.mxu0 %v2591_v16 }
  0x7b   : > { %1427 = vmatprep.subr.mxu1 %v2592_v34  ;;  %1398 = vmatpush3.msra.mxu0 %v2594_v55 }
  0x7c   : > { %1428 = vmatpush3.msra.mxu1 %v2553_v12  ;;  %1399 = vmatprep.subr.mxu0 %v2595_v22  ;;  %v2613_v12 = vld [vmem:[#allocation20_spill] sm:$0xff] }
  0x7d   : > { %1429 = vmatprep.subr.mxu1 %v2554_v58  ;;  %1400 = vmatpush3.msra.mxu0 %v2597_v42  ;;  %v2610_v58 = vld [vmem:[#allocation28_spill] sm:$0xff] }
  0x7e   : > { %1430 = vmatpush3.msra.mxu1 %v2555_v2  ;;  %1401 = vmatprep.subr.mxu0 %v2598_v20 }
  0x7f   : > { %1431 = vmatprep.subr.mxu1 %v2556_v26  ;;  %1402 = vmatpush3.msra.mxu0 %v2600_v6  ;;  %v2606_v26 = vand.u32 4294901760, %v2163_v47 }
  0x80   : > { %1432 = vmatpush3.msra.mxu1 %v2557_v61  ;;  %1403 = vmatprep.subr.mxu0 %v2601_v32  ;;  %v213_v61 = vstv %s212_s11 }
  0x81   : > { %1433 = vmatprep.subr.mxu1 %v2558_v56  ;;  %1404 = vmatpush3.msra.mxu0 %v2602_v28 }
  0x82   : > { %1434 = vmatpush3.msra.mxu1 %v2559_v36  ;;  %1405 = vmatprep.subr.mxu0 %v2603_v46  ;;  %v2611_v36 = vld [vmem:[#allocation19_spill] sm:$0xff] }
  0x83   : > { %1435 = vmatprep.subr.mxu1 %v2560_v27  ;;  %1406 = vmatpush3.msra.mxu0 %v2604_v14 }
  0x84   : > { %1436 = vmatpush3.msra.mxu1 %v2605_v57  ;;  %1407 = vmatprep.subr.mxu0 %v2606_v26 }
  0x85   : > { %1437 = vmatprep.subr.mxu1 %v2607_v53  ;;  %1408 = vmatpush3.msra.mxu0 %v2609_v19 }
  0x86   : > { %1007 = vmatprep.mubr.f32.mxu0 %v2610_v58  ;;  %1438 = vmatpush3.msra.mxu1 %v2611_v36 }
  0x87   : > { %1009 = vmatmul.mubr.f32.vlgmr.msra.gmra.mxu0 %v2612_v54  ;;  %1439 = vmatprep.subr.mxu1 %v2613_v12 }
  0x88   : > { %1440 = vmatpush3.msra.mxu1 %v2564_v7  ;;  %1014 = vmatprep.mubr.f32.mxu0 %v2192_v51 }
  0x89   : > { %1441 = vmatprep.subr.mxu1 %v2566_v44  ;;  %1118 = vmatprep.mubr.f32.mxu1 %v2610_v58 }
  0x8a   : > { %1442 = vmatpush3.msra.mxu1 %v2569_v39 }
  0x8b   : > { %1016 = vmatmul.mubr.f32.gmra.mxu0 %v2198_v52  ;;  %1443 = vmatprep.subr.mxu1 %v2570_v18 }
  0x8c   : > { %1444 = vmatpush3.msra.mxu1 %v2043_v41 }
  0x8d   : > { %1445 = vmatprep.subr.mxu1 %v2060_v48 }
  0x8e   : > { %1446 = vmatpush3.msra.mxu1 %v2078_v24 }
  0x8f   : > { %1120 = vmatmul.mubr.f32.vlgmr.msra.gmra.mxu1 %v2612_v54 }
  0x90   : > { %1125 = vmatprep.mubr.f32.mxu1 %v2192_v51 }
  0x93   : > { %1127 = vmatmul.mubr.f32.gmra.mxu1 %v2198_v52 }
 0x100   : > { %v1257_v43 = vpop.f32.mrf.mxu0 }
 0x102   : > { %v1258_v47 = vpop.f32.mrf.mxu0 }
 0x103   : > { %v1259_v24 = vadd.f32 %v1258_v47, %v1257_v43 }
 0x105   : > { %v323_v62 = vadd.f32 %v1259_v24, %v213_v61 }
 0x108   : > { %v1295_v39 = vpop.f32.mrf.mxu1 }
 0x10a   : > { %v1296_v2 = vpop.f32.mrf.mxu1 }
 0x10b   : > { %v1297_v7 = vadd.f32 %v1296_v2, %v1295_v39 }
 0x10d   : > { %v570_v50 = vadd.f32 %v1297_v7, %v323_v62 }
 0x11d   : > { %v1260_v49 = vpop.f32.mrf.mxu0 }
 0x11f   : > { %v1261_v30 = vpop.f32.mrf.mxu0 }
 0x120   : > { %v1262_v44 = vadd.f32 %v1261_v30, %v1260_v49 }
 0x122   : > { %v1333_v56 = vpop.f32.mrf.mxu0  ;;  %v338_v25 = vadd.f32 %v1262_v44, %v213_v61 }
 0x124   : > { %v1334_v41 = vpop.f32.mrf.mxu0 }
 0x125   : > { %v1335_v31 = vadd.f32 %v1334_v41, %v1333_v56 }
 0x126   : > { %v1298_v37 = vpop.f32.mrf.mxu1 }
 0x127   : > { %v715_v45 = vadd.f32 %v1335_v31, %v570_v50 }
 0x128   : > { %v1299_v1 = vpop.f32.mrf.mxu1 }
 0x129   : > { %v1336_v48 = vpop.f32.mrf.mxu0  ;;  %v1300_v63 = vadd.f32 %v1299_v1, %v1298_v37 }
 0x12b   : > { %v1337_v27 = vpop.f32.mrf.mxu0  ;;  %v577_v59 = vadd.f32 %v1300_v63, %v338_v25 }
 0x12c   : > { %v1338_v38 = vadd.f32 %v1337_v27, %v1336_v48 }
 0x12d   : > { %v1371_v33 = vpop.f32.mrf.mxu1 }
 0x12e   : > { %v724_v10 = vadd.f32 %v1338_v38, %v577_v59 }
 0x12f   : > { %v1372_v51 = vpop.f32.mrf.mxu1 }
 0x130   : > { %v1373_v29 = vadd.f32 %v1372_v51, %v1371_v33 }
 0x132   : > { %v1374_v18 = vpop.f32.mrf.mxu1  ;;  %v832_v5 = vadd.f32 %v1373_v29, %v715_v45 }
 0x134   : > { %v1375_v40 = vpop.f32.mrf.mxu1 }
 0x135   : > { %v1376_v9 = vadd.f32 %v1375_v40, %v1374_v18 }
 0x137   : > { %v843_v17 = vadd.f32 %v1376_v9, %v724_v10 }
 0x147   : > { %v1409_v52 = vpop.f32.mrf.mxu0 }
 0x149   : > { %v1410_v23 = vpop.f32.mrf.mxu0 }
 0x14a   : > { %v1411_v3 = vadd.f32 %v1410_v23, %v1409_v52 }
 0x14b   : > { %v1412_v35 = vpop.f32.mrf.mxu0 }
 0x14c   : > { %v1011_v11 = vadd.f32 %v1411_v3, %v832_v5 }
 0x14d   : > { %v1413_v0 = vpop.f32.mrf.mxu0 }
 0x14e   : > { %v1414_v15 = vadd.f32 %v1413_v0, %v1412_v35 }
 0x14f   : > { %v1447_v4 = vpop.f32.mrf.mxu1 }
 0x150   : > { %v1018_v60 = vadd.f32 %v1414_v15, %v843_v17 }
 0x151   : > { %v1448_v8 = vpop.f32.mrf.mxu1 }
 0x152   : > { %v1449_v16 = vadd.f32 %v1448_v8, %v1447_v4 }
 0x153   : > { %v1450_v34 = vpop.f32.mrf.mxu1 }
 0x154   : > { %v1122_v55 = vadd.f32 %v1449_v16, %v1011_v11 }
 0x155   : > { %v1451_v22 = vpop.f32.mrf.mxu1 }
 0x156   : > { %1132 = vst [vmem:[%s167_s18] sm:$0xff] %v1122_v55  ;;  %v1452_v42 = vadd.f32 %v1451_v22, %v1450_v34 }
 0x158   : > { %v1129_v20 = vadd.f32 %v1452_v42, %v1018_v60 }
 0x15a   : > { %1133 = vst [vmem:[%s167_s18 + $0x8] sm:$0xff] %v1129_v20 }
 0x15b   : > { %1507 = shalt.err (!%p1504_p3)
}
 0x15c   : > { %s1508_s5 = scalar_lea.hbm %s2392_s28, 256  ;;  %s1512_s8 = scalar_lea.hbm %s2437_s3, 1024 }
 0x15d   : > { %p1509_p4 = scmp.ne.s32.totalorder %s2392_s28, %s1508_s5  ;;  %p1513_p9 = scmp.lt.s32.totalorder %s2392_s28, %s2437_s3 }
 0x15e   : > { %p1514_p10 = scmp.lt.s32.totalorder %s1512_s8, %s1508_s5 }
 0x15f   : > { %p1510_p7 = pnand %p1509_p4, %p1620_p5 }
 0x160   : > { %p1515_p11 = por %p1514_p10, %p1513_p9 }
 0x161   : > { %p1511_p8 = pneg %p1510_p7 }
 0x163   : > { %p1516_p12 = pnand %p1515_p11, %p1511_p8 }
 0x165   : > { %1519 = shalt.err (!%p1516_p12)
}
 0x166   : > { %s1557_s11 = smov 128   ;;  %s1558_s12 = smov 8  }
 0x167   : > { %1453 = dma.vmem_to_hbm [thread:$0]  (%p1620_p5), %s2387_s20, 256, %s2392_s28, %s2394_s29, %s1557_s11, %s1557_s11, %s1558_s12  }
 0x168 PF: > { %p1459_p13 = scmp.ge.s32.totalorder %s1554_s17, 2  ;;  %s1163_s13 = sand.u32 1, %s1542_s14  }
 0x169   : > { %s1164_s18 = scalar_lea.sflag [#allocation4], %s1163_s13 }
 0x16a   : > { %p1456_p0 = pnand %p1459_p13, %p1624_p6 }
 0x16c   : > { %p1457_p1 = pneg %p1456_p0 }
 0x16e   : > { %1537 = dma.done.wait (%p1457_p1), %s1164_s18, 256  }
 0x16f   : > { %1539 = vsyncadd (%p1457_p1), %s1164_s18, 4294967040  ;;  %p14_p2 = scmp.ge.s32.totalorder %s1607_s19, 6   ;;  %s2614_s14 = smov %s1546_s15 }
 0x170   : > { %s2615_s15 = smov %s1550_s16  ;;  %s2616_s16 = smov %s1618_s22 }
 0x171   : > { %s2617_s17 = smov %s1607_s19  ;;  %16 = sbr.rel (!%p14_p2) target bundleno = 5 (0x5), region = 67 }
 0x176   :  { %1169 = vsyncpa [#allocation4], 1 }
 0x177   :  { %1171 = vsyncpa [#allocation4 + $0x1], 1 }

</bundles_post_ra>
